<compile_context>
chip_gen: v7x
topology: tpu7x:2x2x1
jax: 0.10.0
libtpu: 0.0.40
codegen_flags: <defaults>
</compile_context>

<pallas_src>
import jax
import jax.numpy as jnp
from jax.experimental import pallas as pl
from jax.experimental.pallas import tpu as pltpu


def _round_up(n: int, m: int) -> int:
    return ((n + m - 1) // m) * m


def _sublanes(dtype) -> int:
    # f32 -> 8, bf16 -> 16, int8/fp8 -> 32 (second-to-last-dim tiling granularity)
    return max(8, 32 // jnp.dtype(dtype).itemsize)


def _padded_tile_bytes(rows: int, cols: int, dtype) -> int:
    # VMEM tile footprint with (sublane, 128-lane) padding.
    it = jnp.dtype(dtype).itemsize
    return _round_up(max(rows, 1), _sublanes(dtype)) * _round_up(max(cols, 1), 128) * it


def _vmem_limit_bytes() -> int:
    # Generation-aware scoped-VMEM limit: ~3/4 of physical, capped at 112 MiB.
    cap = None
    try:
        cap = getattr(pltpu.get_tpu_info(), "vmem_capacity_bytes", None)
    except Exception:
        cap = None
    if not cap:
        cap = 64 * 1024 * 1024  # conservative fallback (v7x per-core VMEM)
    return min(int(cap) * 3 // 4, 112 * 1024 * 1024)


def ae_relu_kernel(x_ref, w_enc_ref, b_enc_ref, w_y_ref, b_y_ref, h_ref, y_ref):
    # ---- encoder: H = relu(X @ W_enc + b_enc) ------------------------------
    # MXU matmul with f32 accumulation (inputs may be f32 or bf16).
    h = jnp.dot(x_ref[...], w_enc_ref[...],
                preferred_element_type=jnp.float32)          # (tb, d_lat) f32
    h = jnp.maximum(h + b_enc_ref[...], 0.0)                 # f32 bias + ReLU (VPU)
    h_ref[...] = h.astype(h_ref.dtype)                       # cast only at the store

    # ---- y_layer: Y = sigmoid(H @ w_y^T + b_y) -----------------------------
    # Output width is 1, so an MXU matmul would fill <1% of a push; use a VPU
    # multiply + XLU lane reduction instead (both slots are idle here).
    y = jnp.sum(h * w_y_ref[...], axis=-1, keepdims=True)    # (tb, 1) f32
    y = y + b_y_ref[0, 0]                                     # SMEM scalar bias
    y_ref[...] = jax.nn.sigmoid(y).astype(y_ref.dtype)        # EUP sigmoid
    # TODO(synk): Y could be made lane-dense (transpose to a (1, tb) slab via the
    # idle XLU) to avoid masked width-1 stores; Y traffic is tiny, low priority.


def ae_relu_forward(x, w_enc, b_enc, w_y, b_y, *, tb=1024, h_dtype=None, y_dtype=None):
    """Pallas forward pass.

    x:     (B, input_dim)
    w_enc: (input_dim, latent_dim)   b_enc: (1, latent_dim)
    w_y:   (1, latent_dim)           b_y:   (1, 1)
    returns (H [B, latent_dim] in h_dtype (default x.dtype),
             Y [B, 1]          in y_dtype (default x.dtype))

    Pass x / w_enc / b_enc / w_y as bf16 on v6e/v7x for ~2x HBM bandwidth;
    accumulation and epilogue math remain f32.
    """
    B, d_in = x.shape
    d_lat = w_enc.shape[1]
    assert w_enc.shape == (d_in, d_lat)
    assert b_enc.shape == (1, d_lat)
    assert w_y.shape == (1, d_lat)
    assert b_y.shape == (1, 1)

    h_dtype = x.dtype if h_dtype is None else jnp.dtype(h_dtype)
    y_dtype = x.dtype if y_dtype is None else jnp.dtype(y_dtype)
    b_y = b_y.astype(jnp.float32)            # 32-bit SMEM scalar

    vmem_limit = _vmem_limit_bytes()
    sub = _sublanes(x.dtype)

    # Batch tile: as large as requested, no larger than the sublane-rounded batch,
    # a multiple of the dtype sublane count, and small enough that the
    # double-buffered X/H/Y tiles plus resident weights fit the VMEM budget.
    tb_eff = min(_round_up(tb, sub), _round_up(B, sub))

    resident = (_padded_tile_bytes(d_in, d_lat, w_enc.dtype)
                + _padded_tile_bytes(1, d_lat, b_enc.dtype)
                + _padded_tile_bytes(1, d_lat, w_y.dtype))

    def _tiles_bytes(t):
        return 2 * (_padded_tile_bytes(t, d_in, x.dtype)
                    + _padded_tile_bytes(t, d_lat, h_dtype)
                    + _padded_tile_bytes(t, 1, y_dtype))

    while tb_eff > sub and resident + _tiles_bytes(tb_eff) > (vmem_limit * 8) // 10:
        tb_eff = _round_up(tb_eff // 2, sub)

    # v7x megacore: give the "parallel" batch axis at least 2 steps when possible
    # so both TensorCores get work.
    if pl.cdiv(B, tb_eff) == 1 and tb_eff > sub:
        tb_eff = _round_up(pl.cdiv(tb_eff, 2), sub)

    grid = (pl.cdiv(B, tb_eff),)

    # Grid-invariant operands: whole-array resident in VMEM (single copy, no
    # per-step double buffering).
    full_vmem = pl.BlockSpec(memory_space=pltpu.MemorySpace.VMEM)
    # TODO(synk): if input_dim*latent_dim ever approaches VMEM capacity (esp. the
    # 64 MiB on v7x), add a K grid axis over d_in marked "arbitrary" with an f32
    # accumulator scratch instead of keeping W_enc fully resident.

    h, y = pl.pallas_call(
        ae_relu_kernel,
        out_shape=(
            jax.ShapeDtypeStruct((B, d_lat), h_dtype),
            jax.ShapeDtypeStruct((B, 1), y_dtype),
        ),
        grid_spec=pltpu.PrefetchScalarGridSpec(
            num_scalar_prefetch=0,
            grid=grid,
            in_specs=[
                pl.BlockSpec((tb_eff, d_in), lambda i: (i, 0)),       # X tile
                full_vmem,                                             # W_enc (resident)
                full_vmem,                                             # b_enc (resident)
                full_vmem,                                             # w_y row (resident)
                pl.BlockSpec(memory_space=pltpu.MemorySpace.SMEM),     # b_y scalar
            ],
            out_specs=[
                pl.BlockSpec((tb_eff, d_lat), lambda i: (i, 0)),       # H tile
                pl.BlockSpec((tb_eff, 1), lambda i: (i, 0)),           # Y tile
            ],
        ),
        compiler_params=pltpu.CompilerParams(
            dimension_semantics=("parallel",),    # batch-parallel (both TCs on v7x)
            vmem_limit_bytes=vmem_limit,          # generation-aware
        ),
    )(x, w_enc, b_enc, w_y, b_y)
    return h, y


def init_params(key, input_dim, latent_dim, dtype=jnp.float32):
    """Deterministic PyTorch-Linear-style (uniform) init."""
    k_enc_w, k_enc_b, k_dec_w, k_dec_b, k_y_w, k_y_b = jax.random.split(key, 6)

    def lin(kw, kb, fan_in, fan_out):
        bound = 1.0 / float(fan_in) ** 0.5
        # stored as (fan_in, fan_out) == transpose of PyTorch's weight
        w = jax.random.uniform(kw, (fan_in, fan_out), dtype, -bound, bound)
        b = jax.random.uniform(kb, (1, fan_out), dtype, -bound, bound)
        return w, b

    w_enc, b_enc = lin(k_enc_w, k_enc_b, input_dim, latent_dim)
    # decoder exists in __init__ but is unused in forward; kept for parity.
    w_dec, b_dec = lin(k_dec_w, k_dec_b, latent_dim, input_dim)
    # y_layer kept in PyTorch layout: weight (1, latent_dim), bias (1, 1).
    w_y_t, b_y = lin(k_y_w, k_y_b, latent_dim, 1)
    w_y = w_y_t.T                      # (1, latent_dim)
    return (w_enc, b_enc), (w_dec, b_dec), (w_y, b_y)


if __name__ == "__main__":
    key = jax.random.PRNGKey(0)
    batch, input_dim, latent_dim = 16, 64, 32

    k_x, k_p = jax.random.split(key)
    x = jax.random.normal(k_x, (batch, input_dim), jnp.float32)
    (w_enc, b_enc), _, (w_y, b_y) = init_params(k_p, input_dim, latent_dim)

    # Pure-JAX reference
    h_ref = jnp.maximum(x @ w_enc + b_enc, 0.0)
    y_ref = jax.nn.sigmoid(h_ref @ w_y.T + b_y)

    # --- f32 run ------------------------------------------------------------
    h, y = ae_relu_forward(x, w_enc, b_enc, w_y, b_y)
    jax.block_until_ready((h, y))
    assert h.shape == (batch, latent_dim) and y.shape == (batch, 1)
    assert jnp.allclose(h, h_ref, atol=1e-5), "H mismatch (f32)"
    assert jnp.allclose(y, y_ref, atol=1e-5), "Y mismatch (f32)"

    # --- ragged batch (not a tile multiple; no jnp.pad copy of X) -----------
    br = batch - 3
    hr, yr = ae_relu_forward(x[:br], w_enc, b_enc, w_y, b_y)
    jax.block_until_ready((hr, yr))
    assert hr.shape == (br, latent_dim) and yr.shape == (br, 1)
    assert jnp.allclose(hr, h_ref[:br], atol=1e-5), "H mismatch (ragged)"
    assert jnp.allclose(yr, y_ref[:br], atol=1e-5), "Y mismatch (ragged)"

    # --- bf16 I/O path (halves dominant HBM traffic; f32 accumulate/epilogue)
    hb, yb = ae_relu_forward(
        x.astype(jnp.bfloat16), w_enc.astype(jnp.bfloat16),
        b_enc.astype(jnp.bfloat16), w_y.astype(jnp.bfloat16), b_y,
        y_dtype=jnp.float32)
    jax.block_until_ready((hb, yb))
    assert jnp.allclose(hb.astype(jnp.float32), h_ref, atol=5e-2, rtol=5e-2), "H mismatch (bf16)"
    assert jnp.allclose(yb, y_ref, atol=2e-2), "Y mismatch (bf16)"

    print("KERNEL_OK")
</pallas_src>

<mosaic_0001>
module attributes {stable_mosaic.version = 11 : i64} {
  func.func @ae_relu_kernel(%arg0: i32, %arg1: memref<8x64xf32, #tpu.memory_space<vmem>>, %arg2: memref<64x32xf32, #tpu.memory_space<vmem>>, %arg3: memref<1x32xf32, #tpu.memory_space<vmem>>, %arg4: memref<1x32xf32, #tpu.memory_space<vmem>>, %arg5: memref<1x1xf32, #tpu.memory_space<smem>>, %arg6: memref<8x32xf32, #tpu.memory_space<vmem>>, %arg7: memref<8x1xf32, #tpu.memory_space<vmem>>) attributes {dimension_semantics = [#tpu.dimension_semantics<parallel>], iteration_bounds = array<i64: 2>, scalar_prefetch = 0 : i64, scratch_operands = 0 : i64, tpu.core_type = #tpu.core_type<tc>, window_params = [{transform_indices = @transform_0, window_bounds = array<i64: 8, 64>}, {pipeline_mode = #tpu.pipeline_mode<synchronous>, transform_indices = @transform_1, window_bounds = array<i64: 64, 32>}, {pipeline_mode = #tpu.pipeline_mode<synchronous>, transform_indices = @transform_2, window_bounds = array<i64: 1, 32>}, {pipeline_mode = #tpu.pipeline_mode<synchronous>, transform_indices = @transform_3, window_bounds = array<i64: 1, 32>}, {transform_indices = @transform_4, window_bounds = array<i64: 1, 1>}, {transform_indices = @transform_5, window_bounds = array<i64: 8, 32>}, {transform_indices = @transform_6, window_bounds = array<i64: 8, 1>}]} {
    %c0 = arith.constant 0 : index
    %c0_0 = arith.constant 0 : index
    %0 = vector.load %arg1[%c0, %c0_0] : memref<8x64xf32, #tpu.memory_space<vmem>>, vector<8x64xf32>
    %c0_1 = arith.constant 0 : index
    %c0_2 = arith.constant 0 : index
    %1 = vector.load %arg2[%c0_1, %c0_2] : memref<64x32xf32, #tpu.memory_space<vmem>>, vector<64x32xf32>
    %cst = arith.constant dense<0.000000e+00> : vector<8x32xf32>
    %2 = tpu.matmul %0, %1, %cst {dimension_numbers = #tpu.dot_dimension_numbers<[1], [0], [0], [1], [0, 0, 1, 1], [], []>} : vector<8x64xf32>, vector<64x32xf32>, vector<8x32xf32> -> vector<8x32xf32>
    %c0_3 = arith.constant 0 : index
    %c0_4 = arith.constant 0 : index
    %3 = vector.load %arg3[%c0_3, %c0_4] : memref<1x32xf32, #tpu.memory_space<vmem>>, vector<1x32xf32>
    %4 = vector.broadcast %3 : vector<1x32xf32> to vector<8x32xf32>
    %5 = arith.addf %2, %4 : vector<8x32xf32>
    %cst_5 = arith.constant 0.000000e+00 : f32
    %6 = vector.broadcast %cst_5 : f32 to vector<8x32xf32>
    %7 = arith.maximumf %5, %6 : vector<8x32xf32>
    %c0_6 = arith.constant 0 : index
    %c0_7 = arith.constant 0 : index
    %8 = vector.load %arg6[%c0_6, %c0_7] : memref<8x32xf32, #tpu.memory_space<vmem>>, vector<8x32xf32>
    tpu.vector_store %arg6[%c0_6, %c0_7], %7 {strides = array<i32>} : memref<8x32xf32, #tpu.memory_space<vmem>>, vector<8x32xf32>,
    %c0_8 = arith.constant 0 : index
    %c0_9 = arith.constant 0 : index
    %9 = vector.load %arg4[%c0_8, %c0_9] : memref<1x32xf32, #tpu.memory_space<vmem>>, vector<1x32xf32>
    %10 = vector.broadcast %9 : vector<1x32xf32> to vector<8x32xf32>
    %11 = arith.mulf %7, %10 : vector<8x32xf32>
    %cst_10 = arith.constant dense<0.000000e+00> : vector<8xf32>
    %12 = vector.multi_reduction <add>, %11, %cst_10 [1] : vector<8x32xf32> to vector<8xf32>
    %13 = vector.shape_cast %12 : vector<8xf32> to vector<8x1xf32>
    %c0_11 = arith.constant 0 : index
    %c0_12 = arith.constant 0 : index
    %14 = memref.load %arg5[%c0_11, %c0_12] : memref<1x1xf32, #tpu.memory_space<smem>>
    %15 = vector.broadcast %14 : f32 to vector<8x1xf32>
    %16 = arith.addf %13, %15 : vector<8x1xf32>
    %17 = arith.negf %16 : vector<8x1xf32>
    %18 = math.exp %17 : vector<8x1xf32>
    %cst_13 = arith.constant 1.000000e+00 : f32
    %19 = vector.broadcast %cst_13 : f32 to vector<8x1xf32>
    %20 = arith.addf %19, %18 : vector<8x1xf32>
    %21 = arith.divf %19, %20 : vector<8x1xf32>
    %c0_14 = arith.constant 0 : index
    %c0_15 = arith.constant 0 : index
    %22 = vector.load %arg7[%c0_14, %c0_15] : memref<8x1xf32, #tpu.memory_space<vmem>>, vector<8x1xf32>
    tpu.vector_store %arg7[%c0_14, %c0_15], %21 {strides = array<i32>} : memref<8x1xf32, #tpu.memory_space<vmem>>, vector<8x1xf32>,
    return
  }
  func.func @transform_0(%arg0: i32) -> (i32, i32) {
    %c0_i32 = arith.constant 0 : i32
    %c0_i32_0 = arith.constant 0 : i32
    return %arg0, %c0_i32 : i32, i32
  }
  func.func @transform_1(%arg0: i32) -> (i32, i32) {
    %c0_i32 = arith.constant 0 : i32
    %c0_i32_0 = arith.constant 0 : i32
    %c0_i32_1 = arith.constant 0 : i32
    return %c0_i32, %c0_i32_0 : i32, i32
  }
  func.func @transform_2(%arg0: i32) -> (i32, i32) {
    %c0_i32 = arith.constant 0 : i32
    %c0_i32_0 = arith.constant 0 : i32
    %c0_i32_1 = arith.constant 0 : i32
    return %c0_i32, %c0_i32_0 : i32, i32
  }
  func.func @transform_3(%arg0: i32) -> (i32, i32) {
    %c0_i32 = arith.constant 0 : i32
    %c0_i32_0 = arith.constant 0 : i32
    %c0_i32_1 = arith.constant 0 : i32
    return %c0_i32, %c0_i32_0 : i32, i32
  }
  func.func @transform_4(%arg0: i32) -> (i32, i32) {
    %c0_i32 = arith.constant 0 : i32
    %c0_i32_0 = arith.constant 0 : i32
    %c0_i32_1 = arith.constant 0 : i32
    return %c0_i32, %c0_i32_0 : i32, i32
  }
  func.func @transform_5(%arg0: i32) -> (i32, i32) {
    %c0_i32 = arith.constant 0 : i32
    %c0_i32_0 = arith.constant 0 : i32
    return %arg0, %c0_i32 : i32, i32
  }
  func.func @transform_6(%arg0: i32) -> (i32, i32) {
    %c0_i32 = arith.constant 0 : i32
    %c0_i32_0 = arith.constant 0 : i32
    return %arg0, %c0_i32 : i32, i32
  }
}

</mosaic_0001>

<bundles_post_ra>
// kernel: tpu_custom_call.1
= control target key start
LH: loop header
LB: loop body
LE: loop exit
PB: predicated region body
PF: predicated region fallthrough
CT: control target
= control target key end

     0   :  { %s819_s0 = inlined_call_operand.vmem [shape: f32[16,64], index: 0, kind: input, shape index: {}]   ;;  %s820_s1 = inlined_call_operand.vmem [shape: f32[64,32], index: 1, kind: input, shape index: {}]   ;;  %s821_s2 = inlined_call_operand.vmem [shape: f32[1,32], index: 2, kind: input, shape index: {}]   ;;  %s822_s3 = inlined_call_operand.vmem [shape: f32[1,32], index: 3, kind: input, shape index: {}]   ;;  %s823_s4 = inlined_call_operand.<no memory space> [shape: f32[1,1], index: 4, kind: input, shape index: {}]   ;;  %s824_s5 = inlined_call_operand.hbm [shape: f32[16,32], index: 5, kind: output, shape index: {0}]   ;;  %s825_s6 = inlined_call_operand.vmem [shape: f32[16,1], index: 6, kind: output, shape index: {1}]  }
   0x1   :  { %12 = sst [smem:[#allocation2]] %s823_s4 }
   0x2   :  { %13 = vsyncpa [#allocation4], 0 }
   0x3   :  { %15 = vsyncpa [#allocation4 + $0x1], 0  ;;  %s685_s23 = smov 0   ;;  %s687_s24 = smov 0  }
   0x4   :  { %s689_s25 = smov 0   ;;  %s691_s26 = smov 0  }
   0x5 LB: > { %s706_s4 = sadd.s32 4294967295, %s641_s26   ;;  %s478_s27 = sadd.s32 4294967294, %s641_s26   ;;  %s641_s26 = sphi %s691_s26, %s831_s26   ;;  %s637_s25 = sphi %s689_s25, %s830_s25   ;;  %s633_s24 = sphi %s687_s24, %s829_s24   ;;  %s629_s23 = sphi %s685_s23, %s828_s23  }
   0x6   : > { %s710_s28 = sadd.s32 1, %s641_s26   ;;  %s138_s29 = sadd.s32 1, %s637_s25 }
   0x7   : > { %s135_s30 = ssub.s32 %s641_s26, %s710_s28  ;;  %p148_p0 = scmp.ne.s32.totalorder %s637_s25, %s633_s24 }
   0x8   : > { %p136_p1 = scmp.eq.s32.totalorder %s135_s30, 0  ;;  %p149_p2 = scmp.eq.s32.totalorder %s706_s4, 1 }
   0x9   : > { %p154_p3 = scmp.ne.s32.totalorder %s633_s24, %s629_s23  ;;  %p155_p4 = scmp.eq.s32.totalorder %s478_s27, 1 }
   0xa   : > { %s721_s7 = scalar_select %p136_p1, %s637_s25, %s138_s29  }
   0xb   : > { %p723_p5 = por %p149_p2, %p148_p0  ;;  %p727_p6 = por %p155_p4, %p154_p3 }
   0xc   : > { %p481_p7 = scmp.ge.s32.totalorder %s641_s26, 1  ;;  %p218_p8 = scmp.lt.s32.totalorder %s641_s26, 3 }
   0xe   : > { %p219_p9 = pnand %p481_p7, %p218_p8 }
   0xf   : > { %v260_v0 = vld [vmem:[%s820_s1] sm:$0xff] (!%p219_p9)  ;;  %v261_v1 = vld [vmem:[%s820_s1 + $0x8] sm:$0xff] (!%p219_p9)  ;;  %v262_v2 = vld [vmem:[%s820_s1 + $0x10] sm:$0xff] (!%p219_p9)  ;;  %v643_v3 = vmov (!%p219_p9), 0.0|0.0   ;;  %vm644_vm0 = vmmov (!%p219_p9), 0   ;;  %v645_v6 = vmov (!%p219_p9), 0.0  }
  0x10   : > { %222 = sbr.rel (%p219_p9) target bundleno = 423 (0x1a7), region = 40  ;;  %521 = vmatprep.subr.bf16.mxu0 (!%p219_p9), %v643_v3  ;;  %v522_v4 = vpack.c.bf16 (!%p219_p9), %v261_v1, %v260_v0  ;;  %v263_v5 = vld [vmem:[%s820_s1 + $0x18] sm:$0xff] (!%p219_p9)  ;;  %518 = vmatprep.mubr.msk.f32.mxu0 (!%p219_p9), %vm644_vm0, %v645_v6  ;;  %p251_p10 = scmp.lt.s32.totalorder (!%p219_p9), %s706_s4, 1  ;;  %v264_v8 = vld [vmem:[%s820_s1 + $0x20] sm:$0xff] (!%p219_p9)  ;;  %v265_v9 = vld [vmem:[%s820_s1 + $0x28] sm:$0xff] (!%p219_p9)  ;;  %vm275_vm1 = vcmask (!%p219_p9), 523264  }
  0x11   : > { %v525_v7 = vpack.c.bf16 (!%p219_p9), %v263_v5, %v262_v2  ;;  %v528_v10 = vpack.c.bf16 (!%p219_p9), %v265_v9, %v264_v8  ;;  %v266_v11 = vld [vmem:[%s820_s1 + $0x30] sm:$0xff] (!%p219_p9)  ;;  %v267_v12 = vld [vmem:[%s820_s1 + $0x38] sm:$0xff] (!%p219_p9)  ;;  %s242_s15 = sand.u32 (!%p219_p9), 1, %s633_s24   ;;  %v485_v15 = vld [vmem:[%s821_s2] ss:$0 sm:$0xff] (!%p219_p9)  ;;  %vm350_vm2 = vcmask (!%p219_p9), 261120  }
  0x12   : > { %523 = vmatpush3.bf16.msra.mxu0 (!%p219_p9), %v522_v4  ;;  %v531_v13 = vpack.c.bf16 (!%p219_p9), %v267_v12, %v266_v11  ;;  %s482_s18 = sshll.u32 (!%p219_p9), %s242_s15, 3  ;;  %v487_v19 = vld [vmem:[%s822_s3] ss:$0 sm:$0xff] (!%p219_p9)  ;;  %s490_s27 = sshll.u32 (!%p219_p9), %s706_s4, 7 }
  0x13   : > { %524 = vmatprep.subr.bf16.mxu0 (!%p219_p9), %v643_v3  ;;  %s244_s21 = scalar_lea.vmem (!%p219_p9), [#allocation3], %s482_s18  ;;  %s778_s12 = scalar_lea.hbm (!%p219_p9), %s824_s5, %s490_s27 }
  0x14   : > { %s392_s29 = sshll.u32 (!%p219_p9), %s244_s21, 4  ;;  %s375_s13 = scalar_lea.sflag (!%p219_p9), [#allocation4], %s242_s15  ;;  %s393_s29 = int_to_ptr.vmem [resolvable:$true] %s392_s29 }
  0x15   : > { %s646_s16 = smov (!%p219_p9), [#allocation3]  }
  0x16   : > { %526 = vmatpush3.bf16.msra.mxu0 (!%p219_p9), %v525_v7  ;;  %s583_s17 = sshll.u32 (!%p219_p9), %s646_s16, 4  ;;  %s584_s17 = int_to_ptr.vmem [resolvable:$false] %s583_s17 }
  0x17   : > { %s753_s22 = scalar_select %p251_p10, %s706_s4, 1  ;;  %527 = vmatprep.subr.bf16.mxu0 %v643_v3 }
  0x18   : > { %s585_s18 = scalar_lea.vmem %s584_s17, 256  ;;  %p586_p0 = scmp.lt.s32.totalorder %s393_s29, %s584_s17 }
  0x19   : > { %s483_s11 = sshll.u32 %s753_s22, 3 }
  0x1a   : > { %529 = vmatpush3.bf16.msra.mxu0 %v528_v10  ;;  %s254_s14 = scalar_lea.vmem %s819_s0, %s483_s11 }
  0x1b   : > { %530 = vmatprep.subr.bf16.mxu0 %v643_v3  ;;  %v259_v14 = vld [vmem:[%s254_s14] sm:$0xff]  ;;  %s579_s14 = scalar_lea.vmem %s393_s29, 128 }
  0x1c   : > { %p580_p11 = scmp.ne.s32.totalorder %s393_s29, %s579_s14  ;;  %p587_p1 = scmp.lt.s32.totalorder %s585_s18, %s579_s14 }
  0x1e   : > { %532 = vmatpush3.bf16.msra.mxu0 %v531_v13  ;;  %p581_p12 = pnand %p580_p11, %p723_p5  ;;  %p588_p2 = por %p587_p1, %p586_p0 }
  0x20   : > { %p582_p13 = pneg %p581_p12 }
  0x21   : > { %519 = vmatmul.mubr.msk.f32.vlgmr.msra.gmra.mrb[0].mxu0 %vm275_vm1, %v259_v14 }
  0x22   : > { %p589_p3 = pnand %p588_p2, %p582_p13 }
  0xf4   : > { %v345_v16 = vpop.f32.mrb[0].mxu0 }
  0xf5   : > { %v346_v17 = vadd.f32 %v485_v15, %v345_v16  ;;  %v520_v18 = vpop.f32.mrb[1].mxu0 }
  0xf7   : > { %v349_v20 = vmax.f32 %v346_v17, 0.0 }
  0xf9   : > { %351 = vst.msk [vmem:[%s244_s21] sm:$0xff] %vm350_vm2, %v349_v20  ;;  %v359_v21 = vmul.f32 %v487_v19, %v349_v20 }
  0xfb   : > { %v360_v22 = vsel %vm350_vm2, %v359_v21, 0.0 }
  0xfc   : > { %361 = vadd.xlane.f32.xlu0 %v360_v22 }
  0xfd   : > { %592 = shalt.err (!%p589_p3)
}
  0xfe   : > { %s593_s4 = scalar_lea.hbm %s778_s12, 128  ;;  %s597_s20 = scalar_lea.hbm %s824_s5, 256 }
  0xff   : > { %p594_p4 = scmp.ne.s32.totalorder %s778_s12, %s593_s4  ;;  %p598_p9 = scmp.lt.u32.totalorder %s778_s12, %s824_s5 }
 0x100   : > { %p599_p10 = scmp.lt.u32.totalorder %s597_s20, %s593_s4  ;;  %p601_p12 = scmp.lt.u32.totalorder %s593_s4, %s778_s12 }
 0x101   : > { %p595_p7 = pnand %p594_p4, %p723_p5 }
 0x102   : > { %p600_p11 = por %p599_p10, %p598_p9 }
 0x103   : > { %p596_p8 = pneg %p595_p7 }
 0x104   : > { %p602_p13 = por %p601_p12, %p600_p11 }
 0x106   : > { %p603_p0 = pnand %p602_p13, %p596_p8 }
 0x108   : > { %606 = shalt.err (!%p603_p0)
}
 0x109   : > { %533 = dma.vmem_to_hbm [thread:$0]  (%p723_p5), %s393_s29, 128, %s778_s12, %s375_s13   ;;  %vm372_vm3 = vcmask 7168  }
 0x10a   : > { %s363_s30 = sld [smem:[#allocation2]]  ;;  %s258_s16 = scalar_lea.vmem %s825_s6, %s483_s11 }
 0x110   : > { %v364_v23 = vstv %s363_s30 }
 0x189   : > { %v362_v24 = vpop.xlane.xlu0 %361 }
 0x18a   : > { %v365_v25 = vadd.f32 %v364_v23, %v362_v24 }
 0x18c   : > { %v488_v26 = vmul.f32 -1.442695, %v365_v25 }
 0x18e   : > { %575 = vpow2.f32 %v488_v26 }
 0x198   : > { %v576_v27 = vpop.eup %575 }
 0x199   : > { %v369_v28 = vadd.f32 1.0, %v576_v27 }
 0x19b   : > { %577 = vrcp.f32 %v369_v28 }
 0x1a5   : > { %v578_v29 = vpop.eup %577 }
 0x1a6   : > { %373 = vst.msk [vmem:[%s258_s16] sm:$0xff] %vm372_vm3, %v578_v29 }
 0x1a7 PF: > { %p539_p5 = scmp.ge.s32.totalorder %s641_s26, 2  ;;  %s407_s8 = sand.u32 1, %s629_s23  }
 0x1a8   : > { %s408_s29 = scalar_lea.sflag [#allocation4], %s407_s8 }
 0x1a9   : > { %p536_p1 = pnand %p539_p5, %p727_p6 }
 0x1ab   : > { %624 = dma.done.wait (!%p536_p1), %s408_s29, 128  }
 0x1ac   : > { %626 = vsyncadd (!%p536_p1), %s408_s29, 4294967168  ;;  %p18_p2 = scmp.ge.s32.totalorder %s710_s28, 4   ;;  %s828_s23 = smov %s633_s24 }
 0x1ad   : > { %s829_s24 = smov %s637_s25  ;;  %s830_s25 = smov %s721_s7 }
 0x1ae   : > { %s831_s26 = smov %s710_s28  ;;  %20 = sbr.rel (!%p18_p2) target bundleno = 5 (0x5), region = 87 }
 0x1b5   :  { %420 = vsyncpa [#allocation4], 1 }
 0x1b6   :  { %422 = vsyncpa [#allocation4 + $0x1], 1 }

</bundles_post_ra>
